<compile_context>
chip_gen: v6e
topology: v6e:2x2x1
jax: 0.10.0
libtpu: 0.0.40
codegen_flags: <defaults>
</compile_context>

<pallas_src>
import jax
import jax.numpy as jnp
from jax import lax
from jax.experimental import pallas as pl
from jax.experimental.pallas import tpu as pltpu

_EPS = 1e-6
_LANES = 128
_STRIP = 8                    # sublane rows per in-kernel strip (1 vreg / intermediate)
_IO_BUDGET_BYTES = 6 << 20    # double-buffered (in + out) block bytes budget


def _adjust_saturation_kernel(sat_ref, x_ref, o_ref):
    """sat_ref: SMEM (1,) f32.  x_ref/o_ref: (3, BH, BW) blocks in native dtype."""
    sat = sat_ref[0]
    _, bh, bw = x_ref.shape

    # Static lane chunks (<=128 lanes each; last one may be partial when BW % 128 != 0).
    lane_chunks = []
    start = 0
    while start < bw:
        size = min(_LANES, bw - start)
        lane_chunks.append((start, size))
        start += size

    def process(row_start, nrows):
        rsl = pl.ds(row_start, nrows)
        for lane_start, nlanes in lane_chunks:
            csl = pl.ds(lane_start, nlanes)
            r = x_ref[0, rsl, csl].astype(jnp.float32)
            g = x_ref[1, rsl, csl].astype(jnp.float32)
            b = x_ref[2, rsl, csl].astype(jnp.float32)

            # ---------------- rgb_to_hsv ----------------
            maxc = jnp.maximum(jnp.maximum(r, g), b)
            minc = jnp.minimum(jnp.minimum(r, g), b)
            v = maxc
            deltac = maxc - minc
            s = deltac * pl.reciprocal(v + _EPS, approx=True)

            deltac_safe = jnp.where(deltac == 0.0, 1.0, deltac)
            inv_d = pl.reciprocal(deltac_safe, approx=True)
            rc = (maxc - r) * inv_d
            gc = (maxc - g) * inv_d
            bc = (maxc - b) * inv_d

            h = 4.0 + gc - rc
            h = jnp.where(g == maxc, 2.0 + rc - bc, h)   # h[maxg] = ...
            h = jnp.where(r == maxc, bc - gc, h)         # h[maxr] = ... (overrides maxg)
            h = jnp.where(minc == maxc, 0.0, h)          # gray pixels

            # ---------------- adjust_saturation_raw ----------------
            s = jnp.clip(s * sat, 0.0, 1.0)

            # ---------------- hsv_to_rgb ----------------
            # h is already in sector units in [-1, 5); wrap instead of /6 -> %1 -> *6.
            h6 = jnp.where(h < 0.0, h + 6.0, h)
            hi = jnp.minimum(jnp.floor(h6), 5.0)         # clamp fp edge hi==6 (kornia %6 parity)
            f = h6 - hi

            p = v * (1.0 - s)
            q = v * (1.0 - f * s)
            t = v * (1.0 - (1.0 - f) * s)

            m1 = hi == 1.0
            m2 = hi == 2.0
            m3 = hi == 3.0
            m4 = hi == 4.0
            m5 = hi == 5.0

            # gather table (per kornia):
            #   r: (v, q, p, p, t, v)   g: (t, v, v, q, p, p)   b: (p, p, t, v, v, q)
            def pick(c0, c1, c2, c3, c4, c5):
                out = jnp.where(m1, c1, c0)
                out = jnp.where(m2, c2, out)
                out = jnp.where(m3, c3, out)
                out = jnp.where(m4, c4, out)
                out = jnp.where(m5, c5, out)
                return out

            o_ref[0, rsl, csl] = pick(v, q, p, p, t, v).astype(o_ref.dtype)
            o_ref[1, rsl, csl] = pick(t, v, v, q, p, p).astype(o_ref.dtype)
            o_ref[2, rsl, csl] = pick(p, p, t, v, v, q).astype(o_ref.dtype)

    n_full = bh // _STRIP

    def strip(i, carry):
        process(pl.multiple_of(i * _STRIP, _STRIP), _STRIP)
        return carry

    if n_full > 0:
        lax.fori_loop(0, n_full, strip, 0)

    rem = bh - n_full * _STRIP            # static tail (only when BH < 8 / not multiple of 8)
    if rem:
        process(n_full * _STRIP, rem)


def _pick_row_block(total_rows: int, n_images: int, row_bytes: int,
                    io_budget_bytes: int = _IO_BUDGET_BYTES,
                    min_grid_steps: int = 8) -> int:
    """Rows per block: multiple of 8 (or full extent if < 8), sized so double-buffered
    in+out block I/O stays under `io_budget_bytes` and the grid gets at least
    `min_grid_steps` total steps when possible (v7x megacore / pipeline overlap)."""
    if total_rows <= 8:
        return total_rows
    cap = max(8, (io_budget_bytes // (4 * row_bytes)) // 8 * 8)        # 2 bufs x (in + out)
    want_blocks = max(1, -(-min_grid_steps // max(n_images, 1)))        # ceil
    split = max(8, (total_rows // want_blocks) // 8 * 8)
    return max(8, min(cap, split, (total_rows // 8) * 8))


def adjust_saturation(x: jax.Array, saturation_factor) -> jax.Array:
    """x: (N, 3, H, W) RGB in [0, 1]. Returns same shape/dtype."""
    N, C, H, W = x.shape
    if C != 3:
        raise ValueError("expected RGB input with 3 channels on dim -3")
    if isinstance(saturation_factor, (int, float)):
        if saturation_factor < 0:
            raise ValueError("Saturation factor must be non-negative.")
        sat = jnp.full((1,), saturation_factor, dtype=jnp.float32)
    else:
        # TODO(synk): per-sample tensor saturation_factor broadcasting not implemented;
        # a scalar (1-element) factor is supported.
        sat = jnp.asarray(saturation_factor, dtype=jnp.float32).reshape(-1)[:1]

    dt_size = jnp.dtype(x.dtype).itemsize
    HW = H * W

    if HW % _LANES == 0:
        # Lane-dense path: free contiguous reshape to (N, 3, rows, 128).
        rows = HW // _LANES
        arr = x.reshape(N, 3, rows, _LANES)
        R = _pick_row_block(rows, N, 3 * _LANES * dt_size)
        grid = (N, pl.cdiv(rows, R))
        block = (pl.Squeezed(), 3, R, _LANES)
    else:
        # W is necessarily not a multiple of 128 here.  Keep native NCHW layout
        # (W = lane dim, last lane-vreg masked) — no host-side pad/slice HBM passes.
        w_pad = pl.cdiv(W, _LANES) * _LANES
        arr = x
        R = _pick_row_block(H, N, 3 * w_pad * dt_size)
        grid = (N, pl.cdiv(H, R))
        block = (pl.Squeezed(), 3, R, W)

    out = pl.pallas_call(
        _adjust_saturation_kernel,
        out_shape=jax.ShapeDtypeStruct(arr.shape, x.dtype),
        grid=grid,
        in_specs=[
            pl.BlockSpec(memory_space=pltpu.MemorySpace.SMEM),       # saturation factor
            pl.BlockSpec(block, lambda n, i: (n, 0, i, 0)),
        ],
        out_specs=pl.BlockSpec(block, lambda n, i: (n, 0, i, 0)),
        compiler_params=pltpu.CompilerParams(
            dimension_semantics=("parallel", "parallel")),
    )(sat, arr)

    return out.reshape(N, 3, H, W)


class AdjustSaturation:
    """Mirror of kornia AdjustSaturation (scalar saturation_factor)."""

    def __init__(self, saturation_factor) -> None:
        self.saturation_factor = saturation_factor

    def __call__(self, x: jax.Array) -> jax.Array:
        return adjust_saturation(x, self.saturation_factor)


def _reference(x: jax.Array, sat: float) -> jax.Array:
    """Pure-JAX reference with exact divides (sanity check for the Pallas plumbing)."""
    xf = x.astype(jnp.float32)
    r, g, b = xf[:, 0], xf[:, 1], xf[:, 2]
    maxc = jnp.maximum(jnp.maximum(r, g), b)
    minc = jnp.minimum(jnp.minimum(r, g), b)
    v = maxc
    deltac = maxc - minc
    s = deltac / (v + _EPS)
    deltac_safe = jnp.where(deltac == 0.0, 1.0, deltac)
    inv_d = 1.0 / deltac_safe
    rc = (maxc - r) * inv_d
    gc = (maxc - g) * inv_d
    bc = (maxc - b) * inv_d
    h = 4.0 + gc - rc
    h = jnp.where(g == maxc, 2.0 + rc - bc, h)
    h = jnp.where(r == maxc, bc - gc, h)
    h = jnp.where(minc == maxc, 0.0, h)
    h = (h / 6.0) % 1.0
    s = jnp.clip(s * sat, 0.0, 1.0)
    h6 = h * 6.0
    hi = jnp.floor(h6) % 6.0
    f = h6 - jnp.floor(h6)
    p = v * (1.0 - s)
    q = v * (1.0 - f * s)
    t = v * (1.0 - (1.0 - f) * s)

    def pick(c0, c1, c2, c3, c4, c5):
        out = jnp.where(hi == 1.0, c1, c0)
        out = jnp.where(hi == 2.0, c2, out)
        out = jnp.where(hi == 3.0, c3, out)
        out = jnp.where(hi == 4.0, c4, out)
        out = jnp.where(hi == 5.0, c5, out)
        return out

    return jnp.stack([pick(v, q, p, p, t, v),
                      pick(t, v, v, q, p, p),
                      pick(p, p, t, v, v, q)], axis=1).astype(x.dtype)


if __name__ == "__main__":
    key = jax.random.PRNGKey(0)
    k1, k2 = jax.random.split(key)

    module = AdjustSaturation(saturation_factor=2.0)

    # Aligned path (H*W % 128 == 0): lane-dense reshaped layout.
    x = jax.random.uniform(k1, (2, 3, 16, 16), dtype=jnp.float32)   # RGB in [0, 1]
    y = module(x)
    jax.block_until_ready(y)
    assert y.shape == x.shape and y.dtype == x.dtype
    assert bool(jnp.allclose(y, _reference(x, 2.0), atol=5e-3, rtol=5e-3))

    # Unaligned path (H*W % 128 != 0): native-layout kernel, no host pad/slice passes.
    xu = jax.random.uniform(k2, (1, 3, 13, 20), dtype=jnp.float32)
    yu = module(xu)
    jax.block_until_ready(yu)
    assert yu.shape == xu.shape and yu.dtype == xu.dtype
    assert bool(jnp.allclose(yu, _reference(xu, 2.0), atol=5e-3, rtol=5e-3))

    print("KERNEL_OK")
</pallas_src>

<mosaic_0001>
module attributes {stable_mosaic.version = 11 : i64} {
  func.func @_adjust_saturation_kernel(%arg0: i32, %arg1: i32, %arg2: memref<1xf32, #tpu.memory_space<smem>>, %arg3: memref<1x3x2x128xf32, #tpu.memory_space<vmem>>, %arg4: memref<1x3x2x128xf32, #tpu.memory_space<vmem>>) attributes {dimension_semantics = [#tpu.dimension_semantics<parallel>, #tpu.dimension_semantics<parallel>], iteration_bounds = array<i64: 2, 1>, scalar_prefetch = 0 : i64, scratch_operands = 0 : i64, tpu.core_type = #tpu.core_type<tc>, window_params = [{transform_indices = @transform_0, window_bounds = array<i64: 1>}, {transform_indices = @transform_1, window_bounds = array<i64: 1, 3, 2, 128>}, {transform_indices = @transform_2, window_bounds = array<i64: 1, 3, 2, 128>}]} {
    %c0 = arith.constant 0 : index
    %0 = memref.load %arg2[%c0] : memref<1xf32, #tpu.memory_space<smem>>
    %c0_0 = arith.constant 0 : index
    %c0_1 = arith.constant 0 : index
    %c0_2 = arith.constant 0 : index
    %c0_3 = arith.constant 0 : index
    %1 = vector.load %arg3[%c0_0, %c0_1, %c0_2, %c0_3] : memref<1x3x2x128xf32, #tpu.memory_space<vmem>>, vector<1x1x2x128xf32>
    %2 = vector.shape_cast %1 : vector<1x1x2x128xf32> to vector<2x128xf32>
    %c0_4 = arith.constant 0 : index
    %c1 = arith.constant 1 : index
    %c0_5 = arith.constant 0 : index
    %c0_6 = arith.constant 0 : index
    %3 = vector.load %arg3[%c0_4, %c1, %c0_5, %c0_6] : memref<1x3x2x128xf32, #tpu.memory_space<vmem>>, vector<1x1x2x128xf32>
    %4 = vector.shape_cast %3 : vector<1x1x2x128xf32> to vector<2x128xf32>
    %c0_7 = arith.constant 0 : index
    %c2 = arith.constant 2 : index
    %c0_8 = arith.constant 0 : index
    %c0_9 = arith.constant 0 : index
    %5 = vector.load %arg3[%c0_7, %c2, %c0_8, %c0_9] : memref<1x3x2x128xf32, #tpu.memory_space<vmem>>, vector<1x1x2x128xf32>
    %6 = vector.shape_cast %5 : vector<1x1x2x128xf32> to vector<2x128xf32>
    %7 = arith.maximumf %2, %4 : vector<2x128xf32>
    %8 = arith.maximumf %7, %6 : vector<2x128xf32>
    %9 = arith.minimumf %2, %4 : vector<2x128xf32>
    %10 = arith.minimumf %9, %6 : vector<2x128xf32>
    %11 = arith.subf %8, %10 : vector<2x128xf32>
    %cst = arith.constant 9.99999997E-7 : f32
    %12 = vector.broadcast %cst : f32 to vector<2x128xf32>
    %13 = arith.addf %8, %12 : vector<2x128xf32>
    %14 = tpu.reciprocal %13 {approx = true} : vector<2x128xf32> -> vector<2x128xf32>
    %15 = arith.mulf %11, %14 : vector<2x128xf32>
    %cst_10 = arith.constant 0.000000e+00 : f32
    %16 = vector.broadcast %cst_10 : f32 to vector<2x128xf32>
    %17 = arith.cmpf oeq, %11, %16 : vector<2x128xf32>
    %cst_11 = arith.constant 1.000000e+00 : f32
    %18 = vector.broadcast %cst_11 : f32 to vector<2x128xf32>
    %19 = arith.select %17, %18, %11 : vector<2x128xi1>, vector<2x128xf32>
    %20 = tpu.reciprocal %19 {approx = true} : vector<2x128xf32> -> vector<2x128xf32>
    %21 = arith.subf %8, %2 : vector<2x128xf32>
    %22 = arith.mulf %21, %20 : vector<2x128xf32>
    %23 = arith.subf %8, %4 : vector<2x128xf32>
    %24 = arith.mulf %23, %20 : vector<2x128xf32>
    %25 = arith.subf %8, %6 : vector<2x128xf32>
    %26 = arith.mulf %25, %20 : vector<2x128xf32>
    %cst_12 = arith.constant 4.000000e+00 : f32
    %27 = vector.broadcast %cst_12 : f32 to vector<2x128xf32>
    %28 = arith.addf %27, %24 : vector<2x128xf32>
    %29 = arith.subf %28, %22 : vector<2x128xf32>
    %30 = arith.cmpf oeq, %4, %8 : vector<2x128xf32>
    %cst_13 = arith.constant 2.000000e+00 : f32
    %31 = vector.broadcast %cst_13 : f32 to vector<2x128xf32>
    %32 = arith.addf %31, %22 : vector<2x128xf32>
    %33 = arith.subf %32, %26 : vector<2x128xf32>
    %34 = arith.select %30, %33, %29 : vector<2x128xi1>, vector<2x128xf32>
    %35 = arith.cmpf oeq, %2, %8 : vector<2x128xf32>
    %36 = arith.subf %26, %24 : vector<2x128xf32>
    %37 = arith.select %35, %36, %34 : vector<2x128xi1>, vector<2x128xf32>
    %38 = arith.cmpf oeq, %10, %8 : vector<2x128xf32>
    %cst_14 = arith.constant 0.000000e+00 : f32
    %39 = vector.broadcast %cst_14 : f32 to vector<2x128xf32>
    %40 = arith.select %38, %39, %37 : vector<2x128xi1>, vector<2x128xf32>
    %41 = vector.broadcast %0 : f32 to vector<2x128xf32>
    %42 = arith.mulf %15, %41 : vector<2x128xf32>
    %cst_15 = arith.constant 0.000000e+00 : f32
    %cst_16 = arith.constant 1.000000e+00 : f32
    %43 = vector.broadcast %cst_15 : f32 to vector<2x128xf32>
    %44 = arith.maximumf %43, %42 : vector<2x128xf32>
    %45 = vector.broadcast %cst_16 : f32 to vector<2x128xf32>
    %46 = arith.minimumf %45, %44 : vector<2x128xf32>
    %cst_17 = arith.constant 0.000000e+00 : f32
    %47 = vector.broadcast %cst_17 : f32 to vector<2x128xf32>
    %48 = arith.cmpf olt, %40, %47 : vector<2x128xf32>
    %cst_18 = arith.constant 6.000000e+00 : f32
    %49 = vector.broadcast %cst_18 : f32 to vector<2x128xf32>
    %50 = arith.addf %40, %49 : vector<2x128xf32>
    %51 = arith.select %48, %50, %40 : vector<2x128xi1>, vector<2x128xf32>
    %52 = math.floor %51 : vector<2x128xf32>
    %cst_19 = arith.constant 5.000000e+00 : f32
    %53 = vector.broadcast %cst_19 : f32 to vector<2x128xf32>
    %54 = arith.minimumf %52, %53 : vector<2x128xf32>
    %55 = arith.subf %51, %54 : vector<2x128xf32>
    %cst_20 = arith.constant 1.000000e+00 : f32
    %56 = vector.broadcast %cst_20 : f32 to vector<2x128xf32>
    %57 = arith.subf %56, %46 : vector<2x128xf32>
    %58 = arith.mulf %8, %57 : vector<2x128xf32>
    %59 = arith.mulf %55, %46 : vector<2x128xf32>
    %cst_21 = arith.constant 1.000000e+00 : f32
    %60 = vector.broadcast %cst_21 : f32 to vector<2x128xf32>
    %61 = arith.subf %60, %59 : vector<2x128xf32>
    %62 = arith.mulf %8, %61 : vector<2x128xf32>
    %cst_22 = arith.constant 1.000000e+00 : f32
    %63 = vector.broadcast %cst_22 : f32 to vector<2x128xf32>
    %64 = arith.subf %63, %55 : vector<2x128xf32>
    %65 = arith.mulf %64, %46 : vector<2x128xf32>
    %cst_23 = arith.constant 1.000000e+00 : f32
    %66 = vector.broadcast %cst_23 : f32 to vector<2x128xf32>
    %67 = arith.subf %66, %65 : vector<2x128xf32>
    %68 = arith.mulf %8, %67 : vector<2x128xf32>
    %cst_24 = arith.constant 1.000000e+00 : f32
    %69 = vector.broadcast %cst_24 : f32 to vector<2x128xf32>
    %70 = arith.cmpf oeq, %54, %69 : vector<2x128xf32>
    %cst_25 = arith.constant 2.000000e+00 : f32
    %71 = vector.broadcast %cst_25 : f32 to vector<2x128xf32>
    %72 = arith.cmpf oeq, %54, %71 : vector<2x128xf32>
    %cst_26 = arith.constant 3.000000e+00 : f32
    %73 = vector.broadcast %cst_26 : f32 to vector<2x128xf32>
    %74 = arith.cmpf oeq, %54, %73 : vector<2x128xf32>
    %cst_27 = arith.constant 4.000000e+00 : f32
    %75 = vector.broadcast %cst_27 : f32 to vector<2x128xf32>
    %76 = arith.cmpf oeq, %54, %75 : vector<2x128xf32>
    %cst_28 = arith.constant 5.000000e+00 : f32
    %77 = vector.broadcast %cst_28 : f32 to vector<2x128xf32>
    %78 = arith.cmpf oeq, %54, %77 : vector<2x128xf32>
    %79 = arith.select %70, %62, %8 : vector<2x128xi1>, vector<2x128xf32>
    %80 = arith.select %72, %58, %79 : vector<2x128xi1>, vector<2x128xf32>
    %81 = arith.select %74, %58, %80 : vector<2x128xi1>, vector<2x128xf32>
    %82 = arith.select %76, %68, %81 : vector<2x128xi1>, vector<2x128xf32>
    %83 = arith.select %78, %8, %82 : vector<2x128xi1>, vector<2x128xf32>
    %c0_29 = arith.constant 0 : index
    %c0_30 = arith.constant 0 : index
    %c0_31 = arith.constant 0 : index
    %c0_32 = arith.constant 0 : index
    %84 = vector.load %arg4[%c0_29, %c0_30, %c0_31, %c0_32] : memref<1x3x2x128xf32, #tpu.memory_space<vmem>>, vector<1x1x2x128xf32>
    %85 = vector.shape_cast %84 : vector<1x1x2x128xf32> to vector<2x128xf32>
    %86 = vector.shape_cast %83 : vector<2x128xf32> to vector<1x1x2x128xf32>
    tpu.vector_store %arg4[%c0_29, %c0_30, %c0_31, %c0_32], %86 {strides = array<i32>} : memref<1x3x2x128xf32, #tpu.memory_space<vmem>>, vector<1x1x2x128xf32>,
    %87 = arith.select %70, %8, %68 : vector<2x128xi1>, vector<2x128xf32>
    %88 = arith.select %72, %8, %87 : vector<2x128xi1>, vector<2x128xf32>
    %89 = arith.select %74, %62, %88 : vector<2x128xi1>, vector<2x128xf32>
    %90 = arith.select %76, %58, %89 : vector<2x128xi1>, vector<2x128xf32>
    %91 = arith.select %78, %58, %90 : vector<2x128xi1>, vector<2x128xf32>
    %c0_33 = arith.constant 0 : index
    %c1_34 = arith.constant 1 : index
    %c0_35 = arith.constant 0 : index
    %c0_36 = arith.constant 0 : index
    %92 = vector.load %arg4[%c0_33, %c1_34, %c0_35, %c0_36] : memref<1x3x2x128xf32, #tpu.memory_space<vmem>>, vector<1x1x2x128xf32>
    %93 = vector.shape_cast %92 : vector<1x1x2x128xf32> to vector<2x128xf32>
    %94 = vector.shape_cast %91 : vector<2x128xf32> to vector<1x1x2x128xf32>
    tpu.vector_store %arg4[%c0_33, %c1_34, %c0_35, %c0_36], %94 {strides = array<i32>} : memref<1x3x2x128xf32, #tpu.memory_space<vmem>>, vector<1x1x2x128xf32>,
    %95 = arith.select %70, %58, %58 : vector<2x128xi1>, vector<2x128xf32>
    %96 = arith.select %72, %68, %95 : vector<2x128xi1>, vector<2x128xf32>
    %97 = arith.select %74, %8, %96 : vector<2x128xi1>, vector<2x128xf32>
    %98 = arith.select %76, %8, %97 : vector<2x128xi1>, vector<2x128xf32>
    %99 = arith.select %78, %62, %98 : vector<2x128xi1>, vector<2x128xf32>
    %c0_37 = arith.constant 0 : index
    %c2_38 = arith.constant 2 : index
    %c0_39 = arith.constant 0 : index
    %c0_40 = arith.constant 0 : index
    %100 = vector.load %arg4[%c0_37, %c2_38, %c0_39, %c0_40] : memref<1x3x2x128xf32, #tpu.memory_space<vmem>>, vector<1x1x2x128xf32>
    %101 = vector.shape_cast %100 : vector<1x1x2x128xf32> to vector<2x128xf32>
    %102 = vector.shape_cast %99 : vector<2x128xf32> to vector<1x1x2x128xf32>
    tpu.vector_store %arg4[%c0_37, %c2_38, %c0_39, %c0_40], %102 {strides = array<i32>} : memref<1x3x2x128xf32, #tpu.memory_space<vmem>>, vector<1x1x2x128xf32>,
    return
  }
  func.func @transform_0(%arg0: i32, %arg1: i32) -> i32 {
    %c0_i32 = arith.constant 0 : i32
    %c0_i32_0 = arith.constant 0 : i32
    return %c0_i32 : i32
  }
  func.func @transform_1(%arg0: i32, %arg1: i32) -> (i32, i32, i32, i32) {
    %c0_i32 = arith.constant 0 : i32
    %c0_i32_0 = arith.constant 0 : i32
    %c0_i32_1 = arith.constant 0 : i32
    return %arg0, %c0_i32, %arg1, %c0_i32_0 : i32, i32, i32, i32
  }
  func.func @transform_2(%arg0: i32, %arg1: i32) -> (i32, i32, i32, i32) {
    %c0_i32 = arith.constant 0 : i32
    %c0_i32_0 = arith.constant 0 : i32
    %c0_i32_1 = arith.constant 0 : i32
    return %arg0, %c0_i32, %arg1, %c0_i32_0 : i32, i32, i32, i32
  }
}

</mosaic_0001>

<bundles_post_ra>
// kernel: tpu_custom_call.1
= control target key start
LH: loop header
LB: loop body
LE: loop exit
PB: predicated region body
PF: predicated region fallthrough
CT: control target
= control target key end

     0   :  { %s756_s0 = inlined_call_operand.<no memory space> [shape: f32[1], index: 0, kind: input, shape index: {}]   ;;  %s757_s1 = inlined_call_operand.hbm [shape: f32[2,3,2,128], index: 1, kind: input, shape index: {}]   ;;  %s758_s2 = inlined_call_operand.hbm [shape: f32[2,3,2,128], index: 2, kind: output, shape index: {}]  }
   0x1   :  { %7 = sst [smem:[#allocation2]] %s756_s0 }
   0x2   :  { %8 = vsyncpa [#allocation4], 0 }
   0x3   :  { %10 = vsyncpa [#allocation4 + $0x1], 0 }
   0x4   :  { %11 = vsyncpa [#allocation5], 0 }
   0x5   :  { %13 = vsyncpa [#allocation5 + $0x1], 0  ;;  %s578_s11 = smov 0   ;;  %s580_s12 = smov 0  }
   0x6   :  { %s582_s13 = smov 0   ;;  %s584_s14 = smov 0  }
   0x7   :  { %s586_s15 = smov 0   ;;  %s588_s16 = smov 0  }
   0x8 LB: > { %s357_s0 = sadd.s32 4294967295, %s552_s16   ;;  %s358_s17 = sadd.s32 4294967294, %s552_s16   ;;  %s552_s16 = sphi %s588_s16, %s19_s16   ;;  %s548_s15 = sphi %s586_s15, %s769_s15   ;;  %s544_s14 = sphi %s584_s14, %s768_s14   ;;  %s540_s13 = sphi %s582_s13, %s767_s13   ;;  %s536_s12 = sphi %s580_s12, %s766_s12   ;;  %s532_s11 = sphi %s578_s11, %s765_s11  }
   0x9   : > { %s31_s18 = sadd.s32 1, %s548_s15  ;;  %s61_s19 = sadd.s32 1, %s540_s13 }
   0xa   : > { %p33_p0 = scmp.ge.s32.totalorder %s31_s18, 2  ;;  %p68_p1 = scmp.ne.s32.totalorder %s540_s13, %s536_s12 }
   0xb   : > { %p69_p2 = scmp.eq.s32.totalorder %s552_s16, 0  ;;  %p74_p3 = scmp.ne.s32.totalorder %s536_s12, %s532_s11 }
   0xc   : > { %s771_s18 = smov (%p33_p0, %s31_s18), 0  ;;  %p75_p5 = scmp.eq.s32.totalorder %s357_s0, 0 }
   0xd   : > { %p619_p4 = por %p69_p2, %p68_p1  ;;  %s56_s21 = ssub.s32 %s548_s15, %s771_s18 }
   0xe   : > { %p100_p6 = scmp.eq.s32.totalorder %s357_s0, 1  ;;  %p59_p7 = scmp.eq.s32.totalorder %s56_s21, 0 }
   0xf   : > { %p625_p8 = por %p75_p5, %p74_p3  ;;  %p106_p10 = scmp.eq.s32.totalorder %s358_s17, 1 }
  0x10   : > { %p629_p9 = por %p100_p6, %p68_p1  ;;  %p386_p13 = scmp.lt.s32.totalorder %s552_s16, 2 }
  0x11   : > { %s634_s24 = scalar_select %p59_p7, %s540_s13, %s61_s19  }
  0x12   : > { %p636_p11 = por %p106_p10, %p74_p3  ;;  %s129_s26 = sand.u32 1, %s540_s13  }
  0x13   : > { %s370_s27 = smul.u32 6, %s129_s26  ;;  %p646_p0 = pnand %p386_p13, %p619_p4 }
  0x14   : > { %s371_s28 = smul.u32 96, %s548_s15  ;;  %p362_p1 = scmp.ge.s32.totalorder %s552_s16, 1 }
  0x15   : > { %s133_s5 = scalar_lea.vmem [#allocation3], %s370_s27  ;;  %s130_s7 = scalar_lea.sflag [#allocation4], %s129_s26 }
  0x16   : > { %s140_s4 = scalar_lea.hbm %s757_s1, %s371_s28  ;;  %s141_s6 = sshll.u32 %s133_s5, 4  ;;  %s142_s6 = int_to_ptr.vmem [resolvable:$true] %s141_s6 }
  0x17   : > { %p446_p2 = pneg %p646_p0  ;;  %s457_s8 = scalar_lea.vmem %s142_s6, 96 }
  0x18   : > { %p458_p3 = scmp.ne.s32.totalorder %s142_s6, %s457_s8  ;;  %s554_s9 = smov [#allocation3]  }
  0x19   : > { %s462_s10 = sshll.u32 %s554_s9, 4  ;;  %s463_s10 = int_to_ptr.vmem [resolvable:$false] %s462_s10 }
  0x1a   : > { %p460_p5 = pnand %p458_p3, %p446_p2  ;;  %s464_s0 = scalar_lea.vmem %s463_s10, 192 }
  0x1b   : > { %p465_p4 = scmp.lt.s32.totalorder %s142_s6, %s463_s10  ;;  %p466_p7 = scmp.lt.s32.totalorder %s464_s0, %s457_s8 }
  0x1c   : > { %p461_p6 = pneg %p460_p5 }
  0x1d   : > { %p467_p10 = por %p466_p7, %p465_p4 }
  0x1f   : > { %p468_p13 = pnand %p467_p10, %p461_p6 }
  0x21   : > { %471 = shalt.err (!%p468_p13)
}
  0x22   : > { %s555_s17 = smov 32   ;;  %s556_s19 = smov 2  }
  0x23   : > { %381 = dma.hbm_to_vmem [thread:$0]  (!%p646_p0), %s140_s4, 96, %s142_s6, %s130_s7, %s555_s17, %s555_s17, %s556_s19  }
  0x24   : > { %p149_p12 = scmp.lt.s32.totalorder %s552_s16, 3 }
  0x26   : > { %p150_p2 = pnand %p362_p1, %p149_p12 }
  0x27   : > { %s662_s20 = sand.u32 (!%p150_p2), 1, %s536_s12  }
  0x28   : > { %153 = sbr.rel (%p150_p2) target bundleno = 114 (0x72), region = 28  ;;  %s156_s26 = scalar_lea.sflag (!%p150_p2), [#allocation4], %s662_s20 }
  0x29   : > { %s372_s21 = smul.u32 (!%p150_p2), 6, %s662_s20 }
  0x2b   : > { %s159_s27 = scalar_lea.vmem (!%p150_p2), [#allocation3], %s372_s21 }
  0x2d   : > { %523 = dma.done.wait (%p625_p8), %s156_s26, 96  }
  0x2e   : > { %525 = vsyncadd (%p625_p8), %s156_s26, 4294967200  ;;  %v181_v0 = vld [vmem:[%s159_s27] sm:$0x3]  ;;  %v363_v1 = vld [vmem:[%s159_s27 + $0x2] sm:$0x3]  ;;  %s180_s28 = sld [smem:[#allocation2]] }
  0x2f   : > { %v364_v2 = vld [vmem:[%s159_s27 + $0x4] sm:$0x3]  ;;  %v186_v3 = vmax.f32 %v181_v0, %v363_v1  ;;  %v188_v4 = vmin.f32 %v181_v0, %v363_v1  ;;  %s179_s22 = scalar_lea.vmem [#allocation6], %s372_s21  ;;  %s373_s30 = smul.u32 96, %s544_s14 }
  0x30   : > { %s272_s29 = sshll.u32 %s179_s22, 4  ;;  %s258_s5 = scalar_lea.sflag [#allocation5], %s662_s20  ;;  %s697_s29 = int_to_ptr.vmem [resolvable:$true] %s272_s29 }
  0x31   : > { %v672_v5 = vmax.f32 %v186_v3, %v364_v2  ;;  %v189_v6 = vmin.f32 %v188_v4, %v364_v2  ;;  %s707_s4 = scalar_lea.hbm %s758_s2, %s373_s30  ;;  %s472_s6 = scalar_lea.vmem %s697_s29, 96 }
  0x32   : > { %p473_p8 = scmp.ne.s32.totalorder %s697_s29, %s472_s6  ;;  %s557_s7 = smov [#allocation6]  }
  0x33   : > { %v190_v7 = vsub.f32 %v672_v5, %v189_v6  ;;  %v191_v8 = vadd.f32 1e-06, %v672_v5  ;;  %v197_v10 = vsub.f32 %v672_v5, %v181_v0  ;;  %v199_v11 = vsub.f32 %v672_v5, %v363_v1  ;;  %s476_s8 = sshll.u32 %s557_s7, 4  ;;  %s477_s8 = int_to_ptr.vmem [resolvable:$false] %s476_s8 }
  0x34   : > { %v201_v12 = vsub.f32 %v672_v5, %v364_v2  ;;  %v214_v21 = vstv %s180_s28  ;;  %vm205_vm1 = vcmp.eq.f32.partialorder %v363_v1, %v672_v5  ;;  %vm209_vm2 = vcmp.eq.f32.partialorder %v181_v0, %v672_v5  ;;  %p474_p12 = pnand %p473_p8, %p629_p9  ;;  %s478_s9 = scalar_lea.vmem %s477_s8, 192 }
  0x35   : > { %vm194_vm0 = vcmp.eq.f32.partialorder %v190_v7, 0.0  ;;  %440 = vrcp.f32 %v191_v8  ;;  %vm212_vm3 = vcmp.eq.f32.partialorder %v189_v6, %v672_v5  ;;  %p479_p1 = scmp.lt.s32.totalorder %s697_s29, %s477_s8  ;;  %p480_p3 = scmp.lt.s32.totalorder %s478_s9, %s472_s6 }
  0x36   : > { %v195_v9 = vsel %vm194_vm0, 1.0, %v190_v7  ;;  %p475_p0 = pneg %p474_p12 }
  0x37   : > { %442 = vrcp.f32 %v195_v9  ;;  %p481_p5 = por %p480_p3, %p479_p1 }
  0x39   : > { %p482_p6 = pnand %p481_p5, %p475_p0 }
  0x42   : > { %v441_v13 = vpop.eup %440 }
  0x43   : > { %v193_v18 = vmul.f32 %v441_v13, %v190_v7 }
  0x44   : > { %v443_v14 = vpop.eup %442 }
  0x45   : > { %v198_v15 = vmul.f32 %v443_v14, %v197_v10  ;;  %v200_v16 = vmul.f32 %v443_v14, %v199_v11  ;;  %v202_v17 = vmul.f32 %v443_v14, %v201_v12  ;;  %v215_v26 = vmul.f32 %v214_v21, %v193_v18 }
  0x47   : > { %v203_v19 = vadd.f32 4.0, %v200_v16  ;;  %v206_v20 = vadd.f32 2.0, %v198_v15  ;;  %v210_v22 = vsub.f32 %v202_v17, %v200_v16  ;;  %v216_v30 = vmax.f32 %v215_v26, 0.0 }
  0x49   : > { %v204_v23 = vsub.f32 %v203_v19, %v198_v15  ;;  %v207_v24 = vsub.f32 %v206_v20, %v202_v17  ;;  %v217_v33 = vmin.f32 %v216_v30, 1.0 }
  0x4b   : > { %v208_v25 = vsel %vm205_vm1, %v207_v24, %v204_v23  ;;  %v224_v36 = vsub.f32 1.0, %v217_v33 }
  0x4c   : > { %v211_v27 = vsel %vm209_vm2, %v210_v22, %v208_v25 }
  0x4d   : > { %v213_v28 = vsel %vm212_vm3, 0.0, %v211_v27  ;;  %v225_v41 = vmul.f32 %v224_v36, %v672_v5 }
  0x4e   : > { %vm218_vm4 = vcmp.lt.f32.partialorder %v213_v28, 0.0  ;;  %v219_v29 = vadd.f32 6.0, %v213_v28 }
  0x50   : > { %v220_v31 = vsel %vm218_vm4, %v219_v29, %v213_v28 }
  0x51   : > { %v221_v32 = vfloor.f32 %v220_v31 }
  0x53   : > { %v222_v34 = vmin.f32 %v221_v32, 5.0 }
  0x55   : > { %v223_v35 = vsub.f32 %v220_v31, %v222_v34  ;;  %vm233_vm5 = vcmp.eq.f32.partialorder %v222_v34, 1.0  ;;  %vm234_vm6 = vcmp.eq.f32.partialorder %v222_v34, 2.0  ;;  %vm235_vm7 = vcmp.eq.f32.partialorder %v222_v34, 3.0 }
  0x56   : > { %vm236_vm8 = vcmp.eq.f32.partialorder %v222_v34, 4.0  ;;  %vm237_vm9 = vcmp.eq.f32.partialorder %v222_v34, 5.0 }
  0x57   : > { %v226_v37 = vmul.f32 %v223_v35, %v217_v33  ;;  %v229_v38 = vsub.f32 1.0, %v223_v35 }
  0x59   : > { %v227_v39 = vsub.f32 1.0, %v226_v37  ;;  %v230_v40 = vmul.f32 %v229_v38, %v217_v33 }
  0x5b   : > { %v228_v42 = vmul.f32 %v227_v39, %v672_v5  ;;  %v231_v43 = vsub.f32 1.0, %v230_v40 }
  0x5d   : > { %v232_v44 = vmul.f32 %v231_v43, %v672_v5  ;;  %v238_v45 = vsel %vm233_vm5, %v228_v42, %v672_v5 }
  0x5e   : > { %v239_v46 = vsel %vm234_vm6, %v225_v41, %v238_v45 }
  0x5f   : > { %v240_v47 = vsel %vm235_vm7, %v225_v41, %v239_v46  ;;  %v244_v48 = vsel %vm233_vm5, %v672_v5, %v232_v44  ;;  %v251_v49 = vsel %vm234_vm6, %v232_v44, %v225_v41 }
  0x60   : > { %v241_v50 = vsel %vm236_vm8, %v232_v44, %v240_v47  ;;  %v245_v51 = vsel %vm234_vm6, %v672_v5, %v244_v48  ;;  %v252_v52 = vsel %vm235_vm7, %v672_v5, %v251_v49 }
  0x61   : > { %v242_v53 = vsel %vm237_vm9, %v672_v5, %v241_v50  ;;  %v246_v54 = vsel %vm235_vm7, %v228_v42, %v245_v51  ;;  %v253_v55 = vsel %vm236_vm8, %v672_v5, %v252_v52 }
  0x62   : > { %243 = vst [vmem:[%s179_s22] sm:$0x3] %v242_v53  ;;  %v247_v56 = vsel %vm236_vm8, %v225_v41, %v246_v54  ;;  %v254_v57 = vsel %vm237_vm9, %v228_v42, %v253_v55 }
  0x63   : > { %v248_v58 = vsel %vm237_vm9, %v225_v41, %v247_v56  ;;  %366 = vst [vmem:[%s179_s22 + $0x4] sm:$0x3] %v254_v57 }
  0x64   : > { %365 = vst [vmem:[%s179_s22 + $0x2] sm:$0x3] %v248_v58 }
  0x65   : > { %485 = shalt.err (!%p482_p6)
}
  0x66   : > { %s486_s10 = scalar_lea.hbm %s707_s4, 96  ;;  %s490_s19 = scalar_lea.hbm %s758_s2, 192 }
  0x67   : > { %p487_p4 = scmp.ne.s32.totalorder %s707_s4, %s486_s10  ;;  %p491_p13 = scmp.lt.s32.totalorder %s707_s4, %s758_s2 }
  0x68   : > { %p492_p2 = scmp.lt.s32.totalorder %s490_s19, %s486_s10 }
  0x69   : > { %p488_p7 = pnand %p487_p4, %p629_p9 }
  0x6a   : > { %p493_p8 = por %p492_p2, %p491_p13 }
  0x6b   : > { %p489_p10 = pneg %p488_p7 }
  0x6d   : > { %p494_p12 = pnand %p493_p8, %p489_p10 }
  0x6f   : > { %497 = shalt.err (!%p494_p12)
}
  0x70   : > { %s558_s27 = smov 32   ;;  %s559_s28 = smov 2  }
  0x71   : > { %376 = dma.vmem_to_hbm [thread:$0]  (%p629_p9), %s697_s29, 96, %s707_s4, %s258_s5, %s558_s27, %s558_s27, %s559_s28  }
  0x72 PF: > { %s287_s22 = sand.u32 1, %s532_s11   ;;  %p764_p0 = scmp.ge.s32.totalorder %s552_s16, 2 }
  0x73   : > { %s288_s30 = scalar_lea.sflag [#allocation5], %s287_s22 }
  0x74   : > { %p383_p1 = pnand %p764_p0, %p636_p11 }
  0x76   : > { %p384_p3 = pneg %p383_p1 }
  0x78   : > { %527 = dma.done.wait (%p384_p3), %s288_s30, 96  }
  0x79   : > { %529 = vsyncadd (%p384_p3), %s288_s30, 4294967200  ;;  %s19_s16 = sadd.s32 1, %s552_s16   ;;  %s765_s11 = smov %s536_s12 }
  0x7a   : > { %p16_p5 = scmp.ge.s32.totalorder %s19_s16, 4   ;;  %s766_s12 = smov %s540_s13 }
  0x7b   : > { %s767_s13 = smov %s634_s24  ;;  %s768_s14 = smov %s548_s15 }
  0x7c   : > { %s769_s15 = smov %s771_s18  ;;  %18 = sbr.rel (!%p16_p5) target bundleno = 8 (0x8), region = 77 }
  0x81   :  { %293 = vsyncpa [#allocation4], 1 }
  0x82   :  { %295 = vsyncpa [#allocation4 + $0x1], 1 }
  0x83   :  { %296 = vsyncpa [#allocation5], 1 }
  0x84   :  { %298 = vsyncpa [#allocation5 + $0x1], 1 }

</bundles_post_ra>
